<compile_context>
chip_gen: v7x
topology: tpu7x:2x2x1
jax: 0.10.0
libtpu: 0.0.40
codegen_flags: <defaults>
</compile_context>

<pallas_src>
import math

import jax
import jax.numpy as jnp
from jax.experimental import pallas as pl
from jax.experimental.pallas import tpu as pltpu


# ----------------------------- hardware budgets ----------------------------- #

_MIB = 1024 * 1024
_VMEM_CAPACITY_CACHE = None


def _vmem_capacity_bytes():
    """Physical VMEM per core (fallback: 128 MiB, the v5e/v6e size)."""
    global _VMEM_CAPACITY_CACHE
    if _VMEM_CAPACITY_CACHE is None:
        cap = 128 * _MIB
        try:
            cap = int(pltpu.get_tpu_info().vmem_capacity_bytes)
        except Exception:
            pass
        _VMEM_CAPACITY_CACHE = cap
    return _VMEM_CAPACITY_CACHE


def _vmem_cap_bytes():
    # Never request more than ~3/4 of physical VMEM (v7x: 48 of 64 MiB), and
    # never more than 96 MiB on the 128 MiB parts.
    return min(_vmem_capacity_bytes() * 3 // 4, 96 * _MIB)


def _fast_path_bytes():
    # Whole-problem-in-VMEM single-shot path (generation aware).
    return min(16 * _MIB, _vmem_capacity_bytes() // 4)


_RESIDENT_X_BYTES = 16 * _MIB  # budget for a double-buffered resident x panel


# --------------------------------- helpers ---------------------------------- #

def _round_up(a, b):
    return (a + b - 1) // b * b


def _pick_tn(N):
    """Largest multiple-of-128 tile <= 1280 dividing round_up(N, 128).

    <=1280 keeps grid[1] large (>=25 for N=32000) so both v7x TensorCores get
    work even when grid[0] == 1 (decode)."""
    np_ = _round_up(N, 128)
    for cand in range(min(1280, np_), 127, -128):
        if np_ % cand == 0:
            return cand, np_
    return 128, np_


def _pick_tk(K):
    """Largest multiple-of-128 tile <= 512 dividing round_up(K, 128).

    For ins=6566: Kp=6656=52*128=13*512 -> tk=512, only +1.4% K padding."""
    kp = _round_up(K, 128)
    for cand in range(min(512, kp), 127, -128):
        if kp % cand == 0:
            return cand, kp
    return 128, kp


def _pick_tm(M):
    # Small M (decode): one sublane-aligned block. Larger M: scale tm up so the
    # big weight operand is re-streamed fewer (ceil(M/tm)) times.
    if M <= 256:
        return max(8, _round_up(M, 8))
    if M <= 1024:
        return 512
    return 1024


# --------------------------------- kernels ---------------------------------- #

def _single_shot_kernel(x_ref, w_ref, o_ref):
    # Whole problem resident in VMEM; one MXU matmul, no grid overhead.
    o_ref[...] = jnp.dot(
        x_ref[...], w_ref[...], preferred_element_type=jnp.float32
    ).astype(o_ref.dtype)


def _make_tiled_kernel(tk, nk, use_acc):
    """Tiled matmul body. The x block is either (tm, tk) (streamed per k) or a
    resident (tm, Kp) row panel sliced along K in-kernel -- distinguished by
    its static shape."""

    def kernel(x_ref, w_ref, o_ref, *scratch):
        k = pl.program_id(2)
        if x_ref.shape[1] == tk:
            x_blk = x_ref[...]
        else:
            start = pl.multiple_of(k * tk, tk)
            x_blk = x_ref[:, pl.ds(start, tk)]

        part = jnp.dot(x_blk, w_ref[...], preferred_element_type=jnp.float32)

        if nk == 1:
            # Shallow K: single shot, no zero-init / read-modify-write.
            o_ref[...] = part.astype(o_ref.dtype)
        elif not use_acc:
            # f32 output: accumulate directly into the resident output block.
            @pl.when(k == 0)
            def _():
                o_ref[...] = jnp.zeros_like(o_ref)

            o_ref[...] += part
        else:
            # Narrow output dtype: accumulate in f32 scratch, cast once.
            acc_ref = scratch[0]

            @pl.when(k == 0)
            def _():
                acc_ref[...] = jnp.zeros_like(acc_ref)

            acc_ref[...] += part

            @pl.when(k == nk - 1)
            def _():
                o_ref[...] = acc_ref[...].astype(o_ref.dtype)

    return kernel


# --------------------------------- drivers ---------------------------------- #

def _vhead_matmul_single(x2d, w):
    M, K = x2d.shape
    Kw, N = w.shape
    assert K == Kw
    item = jnp.dtype(w.dtype).itemsize
    cost = pl.CostEstimate(
        flops=2 * M * N * K,
        transcendentals=0,
        bytes_accessed=(M * K + K * N + M * N) * item,
    )
    return pl.pallas_call(
        _single_shot_kernel,
        out_shape=jax.ShapeDtypeStruct((M, N), x2d.dtype),
        cost_estimate=cost,
        compiler_params=pltpu.CompilerParams(
            vmem_limit_bytes=min(32 * _MIB, _vmem_cap_bytes())
        ),
    )(x2d, w)


def _vhead_matmul_tiled(x2d, w_padded, n_valid, *, tn, tk, tm=None):
    """y = x2d @ w_padded[:K, :n_valid].

    x2d:       [M, K]  (K <= Kp)
    w_padded:  [Kp, Np] pre-padded so Kp % tk == 0 and Np % tn == 0 (done ONCE
               at module init -- no per-call weight pad / copy).
    """
    M, K = x2d.shape
    Kp, Np = w_padded.shape
    assert Kp % tk == 0 and Np % tn == 0 and Kp >= K

    if tm is None:
        tm = _pick_tm(M)
    Mp = _round_up(M, tm)

    # Only x (the small operand) is padded per call; zeros along K contribute
    # nothing, padded M rows are sliced off afterwards.
    if (Mp, Kp) != (M, K):
        x2d = jnp.pad(x2d, ((0, Mp - M), (0, Kp - K)))

    out_dtype = x2d.dtype
    nk = Kp // tk
    grid = (Mp // tm, Np // tn, nk)

    x_item = jnp.dtype(x2d.dtype).itemsize
    w_item = jnp.dtype(w_padded.dtype).itemsize
    o_item = jnp.dtype(out_dtype).itemsize

    # Decode / small-M regime: keep the whole (tm, Kp) row panel of x resident;
    # it is DMA'd once per i instead of once per (i, j).
    resident_x = 2 * tm * Kp * x_item <= _RESIDENT_X_BYTES
    if resident_x:
        x_spec = pl.BlockSpec((tm, Kp), lambda i, j, k: (i, 0))
        x_hbm_bytes = Mp * Kp * x_item
        x_vmem = 2 * tm * Kp * x_item
    else:
        x_spec = pl.BlockSpec((tm, tk), lambda i, j, k: (i, k))
        x_hbm_bytes = grid[1] * Mp * Kp * x_item
        x_vmem = 2 * tm * tk * x_item

    use_acc = (nk > 1) and (jnp.dtype(out_dtype) != jnp.dtype(jnp.float32))

    working = x_vmem + 2 * tk * tn * w_item + 2 * tm * tn * o_item
    if use_acc:
        working += tm * tn * 4
    vmem_limit = min(max(32 * _MIB, int(1.25 * working)), _vmem_cap_bytes())

    cost = pl.CostEstimate(
        flops=2 * Mp * Np * Kp,
        transcendentals=0,
        bytes_accessed=x_hbm_bytes + grid[0] * Kp * Np * w_item + Mp * Np * o_item,
    )

    kernel = _make_tiled_kernel(tk, nk, use_acc)
    scratch = [pltpu.VMEM((tm, tn), jnp.float32)] if use_acc else []

    y = pl.pallas_call(
        kernel,
        out_shape=jax.ShapeDtypeStruct((Mp, Np), out_dtype),
        grid=grid,
        in_specs=[
            x_spec,
            pl.BlockSpec((tk, tn), lambda i, j, k: (k, j)),
        ],
        out_specs=pl.BlockSpec((tm, tn), lambda i, j, k: (i, j)),
        scratch_shapes=scratch,
        cost_estimate=cost,
        compiler_params=pltpu.CompilerParams(
            dimension_semantics=("parallel", "parallel", "arbitrary"),
            vmem_limit_bytes=vmem_limit,
        ),
    )(x2d, w_padded)

    if Mp != M or Np != n_valid:
        y = y[:M, :n_valid]
    return y


def vhead_matmul(x2d, w, *, tm=None, tn=None, tk=None, force_tiled=False):
    """General y = x2d @ w ([M, K] @ [K, N]).

    Convenience entry point (may pad `w` per call). The VheadPallas module
    below pre-pads the weight ONCE at init and should be used for the real
    (large) logits head.
    """
    M, K = x2d.shape
    Kw, N = w.shape
    assert K == Kw

    if not force_tiled:
        item = max(jnp.dtype(x2d.dtype).itemsize, jnp.dtype(w.dtype).itemsize)
        if (M * K + K * N + M * N) * item <= _fast_path_bytes():
            return _vhead_matmul_single(x2d, w)

    if tk is None:
        tk, Kp = _pick_tk(K)
    else:
        Kp = _round_up(K, tk)
    if tn is None:
        tn, Np = _pick_tn(N)
    else:
        Np = _round_up(N, tn)
    if (Kp, Np) != (K, N):
        w = jnp.pad(w, ((0, Kp - K), (0, Np - N)))
    return _vhead_matmul_tiled(x2d, w, n_valid=N, tn=tn, tk=tk, tm=tm)


# --------------------------------- module ------------------------------------ #

class VheadPallas:
    """JAX/Pallas equivalent of the PyTorch Vhead module (Linear, no bias).

    The weight is stored pre-transposed ([ins, outs]) and pre-padded ONCE to a
    tile-aligned [Kp, Np], so the forward pass never copies the (possibly ~GB)
    weight through HBM again. `dtype=jnp.bfloat16` halves the weight stream
    (biggest lever for the memory-bound logits head); kept float32 by default
    to match the torch module's numerics.
    """

    def __init__(self, ins=6566, outs=32000, *, key=None, dtype=jnp.float32):
        if key is None:
            key = jax.random.PRNGKey(0)
        bound = 1.0 / math.sqrt(ins)
        # nn.Linear-style init, weight in torch layout [outs, ins].
        w_torch_layout = jax.random.uniform(
            key, (outs, ins), dtype=jnp.float32, minval=-bound, maxval=bound
        )
        w = jnp.asarray(w_torch_layout.T, dtype=dtype)  # [ins, outs]

        self.ins = ins
        self.outs = outs
        self.dtype = jnp.dtype(dtype)

        # Tile sizes chosen once from the weight shape: tn divides the
        # 128-rounded vocab dim (1280 | 32000 -> no N pad / no output slice),
        # tk divides the 128-rounded hidden dim (6566 -> 6656 = 13 * 512).
        self.tn, self.Np = _pick_tn(outs)
        self.tk, self.Kp = _pick_tk(ins)
        if (self.Kp, self.Np) != (ins, outs):
            w = jnp.pad(w, ((0, self.Kp - ins), (0, self.Np - outs)))
        self.w = w  # [Kp, Np], tile aligned

    def weight(self):
        """Logical (unpadded) [ins, outs] weight."""
        return self.w[: self.ins, : self.outs]

    def __call__(self, x):
        # x: [..., ins] -> y: [..., outs]
        lead = x.shape[:-1]
        M = math.prod(lead) if lead else 1
        x2d = x.reshape(M, self.ins).astype(self.w.dtype)

        item = jnp.dtype(self.w.dtype).itemsize
        total = (M * self.ins + self.ins * self.outs + M * self.outs) * item
        if total <= _fast_path_bytes():
            if self.Kp != self.ins:
                x2d = jnp.pad(x2d, ((0, 0), (0, self.Kp - self.ins)))
            y2d = _vhead_matmul_single(x2d, self.w)
            if self.Np != self.outs:
                y2d = y2d[:, : self.outs]
        else:
            y2d = _vhead_matmul_tiled(
                x2d, self.w, n_valid=self.outs, tn=self.tn, tk=self.tk
            )
        return y2d.reshape(*lead, self.outs)


if __name__ == "__main__":
    key = jax.random.PRNGKey(0)
    kx, kw, kx2, kw2, kx3, kw3 = jax.random.split(key, 6)

    # ---- 1) Small Vhead shapes -> whole-problem-in-VMEM fast path ----------
    B, S, INS, OUTS = 2, 8, 256, 512
    x = jax.random.normal(kx, (B, S, INS), dtype=jnp.float32)
    model = VheadPallas(INS, OUTS, key=kw)
    y = jax.block_until_ready(model(x))
    y_ref = x @ model.weight()
    assert y.shape == (B, S, OUTS)
    assert jnp.allclose(y, y_ref, atol=2e-2, rtol=2e-2), "fast path mismatch"

    # ---- 2) Tiled path: non-divisible dims, resident-x panel, f32 accum ----
    M2, K2, N2 = 200, 300, 650
    x2 = jax.random.normal(kx2, (M2, K2), dtype=jnp.float32)
    w2 = jax.random.normal(kw2, (K2, N2), dtype=jnp.float32) * 0.05
    y2 = jax.block_until_ready(
        vhead_matmul(x2, w2, tm=64, tn=128, tk=128, force_tiled=True)
    )
    y2_ref = x2 @ w2
    assert y2.shape == (M2, N2)
    assert jnp.allclose(y2, y2_ref, atol=2e-2, rtol=2e-2), "tiled f32 mismatch"

    # ---- 3) Tiled path: bf16 output -> f32 scratch accumulator -------------
    M3, K3, N3 = 128, 384, 640
    x3 = jax.random.normal(kx3, (M3, K3), dtype=jnp.float32).astype(jnp.bfloat16)
    w3 = (jax.random.normal(kw3, (K3, N3), dtype=jnp.float32) * 0.05).astype(
        jnp.bfloat16
    )
    y3 = jax.block_until_ready(vhead_matmul(x3, w3, tk=128, force_tiled=True))
    y3_ref = (x3.astype(jnp.float32) @ w3.astype(jnp.float32)).astype(jnp.bfloat16)
    assert y3.shape == (M3, N3)
    assert jnp.allclose(
        y3.astype(jnp.float32), y3_ref.astype(jnp.float32), atol=5e-2, rtol=5e-2
    ), "tiled bf16 mismatch"

    print("KERNEL_OK")
</pallas_src>

<mosaic_0001>
module attributes {stable_mosaic.version = 11 : i64} {
  func.func @_single_shot_kernel(%arg0: memref<16x256xf32, #tpu.memory_space<vmem>>, %arg1: memref<256x512xf32, #tpu.memory_space<vmem>>, %arg2: memref<16x512xf32, #tpu.memory_space<vmem>>) attributes {dimension_semantics = [], scalar_prefetch = 0 : i64, scratch_operands = 0 : i64, tpu.core_type = #tpu.core_type<tc>} {
    %c0 = arith.constant 0 : index
    %c0_0 = arith.constant 0 : index
    %0 = vector.load %arg0[%c0, %c0_0] : memref<16x256xf32, #tpu.memory_space<vmem>>, vector<16x256xf32>
    %c0_1 = arith.constant 0 : index
    %c0_2 = arith.constant 0 : index
    %1 = vector.load %arg1[%c0_1, %c0_2] : memref<256x512xf32, #tpu.memory_space<vmem>>, vector<256x512xf32>
    %cst = arith.constant dense<0.000000e+00> : vector<16x512xf32>
    %2 = tpu.matmul %0, %1, %cst {dimension_numbers = #tpu.dot_dimension_numbers<[1], [0], [0], [1], [0, 0, 1, 1], [], []>} : vector<16x256xf32>, vector<256x512xf32>, vector<16x512xf32> -> vector<16x512xf32>
    %c0_3 = arith.constant 0 : index
    %c0_4 = arith.constant 0 : index
    %3 = vector.load %arg2[%c0_3, %c0_4] : memref<16x512xf32, #tpu.memory_space<vmem>>, vector<16x512xf32>
    tpu.vector_store %arg2[%c0_3, %c0_4], %2 {strides = array<i32>} : memref<16x512xf32, #tpu.memory_space<vmem>>, vector<16x512xf32>,
    return
  }
}

</mosaic_0001>

<bundles_post_ra>
// kernel: tpu_custom_call.1
= control target key start
LH: loop header
LB: loop body
LE: loop exit
PB: predicated region body
PF: predicated region fallthrough
CT: control target
= control target key end

     0   :  { %7 = vsyncpa [#allocation3], 0  ;;  %s623_s0 = inlined_call_operand.hbm [shape: f32[16,256], index: 0, kind: input, shape index: {}]   ;;  %s624_s1 = inlined_call_operand.hbm [shape: f32[256,512], index: 1, kind: input, shape index: {}]   ;;  %s625_s2 = inlined_call_operand.hbm [shape: f32[16,512], index: 2, kind: output, shape index: {}]  }
   0x1   :  { %8 = vsyncpa [#allocation6], 0 }
   0x2   :  { %9 = vsyncpa [#allocation4], 0  ;;  %s559_s9 = smov [#allocation2]   ;;  %s487_s13 = scalar_lea.hbm %s623_s0, 512 }
   0x3   :  { %s15_s10 = sshll.u32 %s559_s9, 4  ;;  %p488_p0 = scmp.ne.s32.totalorder %s623_s0, %s487_s13  ;;  %s16_s10 = int_to_ptr.vmem [resolvable:$true] %s15_s10 }
   0x4   :  { %p491_p1 = scmp.lt.u32.totalorder %s487_s13, %s623_s0 }
   0x6   :  { %p493_p2 = pnand %p491_p1, %p488_p0 }
   0x8   :  { %496 = shalt.err (!%p493_p2)
}
   0x9   :  { %s497_s18 = scalar_lea.vmem %s16_s10, 512  ;;  %p502_p4 = scmp.lt.s32.totalorder %s16_s10, %s16_s10 }
   0xa   :  { %p498_p3 = scmp.ne.s32.totalorder %s16_s10, %s497_s18  ;;  %p503_p5 = scmp.lt.s32.totalorder %s497_s18, %s497_s18 }
   0xc   :  { %p504_p6 = por %p503_p5, %p502_p4 }
   0xe   :  { %p505_p7 = pnand %p504_p6, %p498_p3 }
  0x10   :  { %508 = shalt.err (!%p505_p7)
}
  0x11   :  { %s560_s19 = smov 256   ;;  %s561_s20 = smov 16  }
  0x12   :  { %21 = dma.hbm_to_vmem [thread:$0]  %s623_s0, 512, %s16_s10, [#allocation3], %s560_s19, %s560_s19, %s561_s20  }
  0x13   :  { %s562_s23 = smov [#allocation5]   ;;  %s509_s27 = scalar_lea.hbm %s624_s1, 16384 }
  0x14   :  { %s27_s24 = sshll.u32 %s562_s23, 4  ;;  %p510_p8 = scmp.ne.s32.totalorder %s624_s1, %s509_s27  ;;  %s28_s24 = int_to_ptr.vmem [resolvable:$true] %s27_s24 }
  0x15   :  { %p513_p9 = scmp.lt.u32.totalorder %s509_s27, %s624_s1 }
  0x17   :  { %p515_p10 = pnand %p513_p9, %p510_p8 }
  0x19   :  { %518 = shalt.err (!%p515_p10)
}
  0x1a   :  { %s519_s4 = scalar_lea.vmem %s28_s24, 16384  ;;  %p524_p12 = scmp.lt.s32.totalorder %s28_s24, %s28_s24 }
  0x1b   :  { %p520_p11 = scmp.ne.s32.totalorder %s28_s24, %s519_s4  ;;  %p525_p13 = scmp.lt.s32.totalorder %s519_s4, %s519_s4 }
  0x1d   :  { %p526_p0 = por %p525_p13, %p524_p12 }
  0x1f   :  { %p527_p1 = pnand %p526_p0, %p520_p11 }
  0x21   :  { %530 = shalt.err (!%p527_p1)
}
  0x22   :  { %s563_s0 = smov 512   ;;  %s564_s5 = smov 32  }
  0x23   :  { %33 = dma.hbm_to_vmem [thread:$0]  %s624_s1, 16384, %s28_s24, [#allocation6], %s563_s0, %s563_s0, %s564_s5  }
  0x24   :  { %553 = dma.done.wait [#allocation3], 512  }
  0x25   :  { %554 = vsyncadd [#allocation3], 4294966784 }
  0x26   :  { %555 = dma.done.wait [#allocation6], 16384  }
  0x27   :  { %556 = vsyncadd [#allocation6], 4294950912  ;;  %v45_v0 = vld [vmem:[#allocation5 + $0x8] sm:$0xff]  ;;  %v47_v2 = vld [vmem:[#allocation5 + $0x18] sm:$0xff]  ;;  %s565_s1 = smov [#allocation7]  }
  0x28   :  { %v49_v1 = vld [vmem:[#allocation5 + $0x28] sm:$0xff]  ;;  %v51_v4 = vld [vmem:[#allocation5 + $0x38] sm:$0xff]  ;;  %v44_v5 = vld [vmem:[#allocation5] sm:$0xff]  ;;  %s339_s8 = sshll.u32 %s565_s1, 4  ;;  %s340_s8 = int_to_ptr.vmem [resolvable:$true] %s339_s8 }
  0x29   :  { %v352_v3 = vpack.c.bf16 %v49_v1, %v45_v0  ;;  %v48_v6 = vld [vmem:[#allocation5 + $0x20] sm:$0xff]  ;;  %v416_v7 = vpack.c.bf16 %v51_v4, %v47_v2  ;;  %v46_v9 = vld [vmem:[#allocation5 + $0x10] sm:$0xff]  ;;  %v53_v11 = vld [vmem:[#allocation5 + $0x48] sm:$0xff]  ;;  %s531_s9 = scalar_lea.vmem %s340_s8, 1024  ;;  %p536_p3 = scmp.lt.s32.totalorder %s340_s8, %s340_s8 }
  0x2a   :  { %v354_v8 = vpack.c.bf16 %v48_v6, %v44_v5  ;;  %v50_v10 = vld [vmem:[#allocation5 + $0x30] sm:$0xff]  ;;  %v57_v13 = vld [vmem:[#allocation5 + $0x68] sm:$0xff]  ;;  %v55_v14 = vld [vmem:[#allocation5 + $0x58] sm:$0xff]  ;;  %p532_p2 = scmp.ne.s32.totalorder %s340_s8, %s531_s9  ;;  %p537_p4 = scmp.lt.s32.totalorder %s531_s9, %s531_s9 }
  0x2b   :  { %353 = vmatprep.subr.bf16.mxu0 %v352_v3  ;;  %v418_v12 = vpack.c.bf16 %v50_v10, %v46_v9  ;;  %v59_v15 = vld [vmem:[#allocation5 + $0x78] sm:$0xff]  ;;  %417 = vmatprep.subr.bf16.mxu1 %v416_v7  ;;  %v356_v16 = vpack.c.bf16 %v57_v13, %v53_v11  ;;  %v52_v18 = vld [vmem:[#allocation5 + $0x40] sm:$0xff]  ;;  %v54_v20 = vld [vmem:[#allocation5 + $0x50] sm:$0xff] }
  0x2c   :  { %355 = vmatpush1.bf16.msra.mxu0 %v354_v8  ;;  %v420_v17 = vpack.c.bf16 %v59_v15, %v55_v14  ;;  %v56_v19 = vld [vmem:[#allocation5 + $0x60] sm:$0xff]  ;;  %v58_v22 = vld [vmem:[#allocation5 + $0x70] sm:$0xff]  ;;  %v61_v23 = vld [vmem:[#allocation5 + $0x88] sm:$0xff]  ;;  %p538_p5 = por %p537_p4, %p536_p3 }
  0x2d   :  { %419 = vmatpush1.bf16.msra.mxu1 %v418_v12  ;;  %v358_v21 = vpack.c.bf16 %v56_v19, %v52_v18  ;;  %v65_v24 = vld [vmem:[#allocation5 + $0xa8] sm:$0xff]  ;;  %357 = vmatprep.subr.bf16.mxu0 %v356_v16  ;;  %v422_v25 = vpack.c.bf16 %v58_v22, %v54_v20  ;;  %v63_v27 = vld [vmem:[#allocation5 + $0x98] sm:$0xff]  ;;  %v60_v29 = vld [vmem:[#allocation5 + $0x80] sm:$0xff] }
  0x2e   :  { %421 = vmatprep.subr.bf16.mxu1 %v420_v17  ;;  %v360_v26 = vpack.c.bf16 %v65_v24, %v61_v23  ;;  %v67_v28 = vld [vmem:[#allocation5 + $0xb8] sm:$0xff]  ;;  %v64_v31 = vld [vmem:[#allocation5 + $0xa0] sm:$0xff]  ;;  %v62_v32 = vld [vmem:[#allocation5 + $0x90] sm:$0xff]  ;;  %p539_p6 = pnand %p538_p5, %p532_p2 }
  0x2f   :  { %v424_v30 = vpack.c.bf16 %v67_v28, %v63_v27  ;;  %v66_v33 = vld [vmem:[#allocation5 + $0xb0] sm:$0xff]  ;;  %v362_v34 = vpack.c.bf16 %v64_v31, %v60_v29  ;;  %v69_v35 = vld [vmem:[#allocation5 + $0xc8] sm:$0xff]  ;;  %v71_v37 = vld [vmem:[#allocation5 + $0xd8] sm:$0xff] }
  0x30   :  { %359 = vmatpush1.bf16.msra.mxu0 %v358_v21  ;;  %v73_v36 = vld [vmem:[#allocation5 + $0xe8] sm:$0xff]  ;;  %v426_v38 = vpack.c.bf16 %v66_v33, %v62_v32  ;;  %v75_v40 = vld [vmem:[#allocation5 + $0xf8] sm:$0xff]  ;;  %v68_v41 = vld [vmem:[#allocation5 + $0xc0] sm:$0xff] }
  0x31   :  { %423 = vmatpush1.bf16.msra.mxu1 %v422_v25  ;;  %361 = vmatprep.subr.bf16.mxu0 %v360_v26  ;;  %v364_v39 = vpack.c.bf16 %v73_v36, %v69_v35  ;;  %v72_v42 = vld [vmem:[#allocation5 + $0xe0] sm:$0xff]  ;;  %v428_v43 = vpack.c.bf16 %v75_v40, %v71_v37  ;;  %v70_v44 = vld [vmem:[#allocation5 + $0xd0] sm:$0xff]  ;;  %v77_v46 = vld [vmem:[#allocation5 + $0x108] sm:$0xff] }
  0x32   :  { %425 = vmatprep.subr.bf16.mxu1 %v424_v30  ;;  %v74_v45 = vld [vmem:[#allocation5 + $0xf0] sm:$0xff]  ;;  %v81_v47 = vld [vmem:[#allocation5 + $0x128] sm:$0xff]  ;;  %v79_v48 = vld [vmem:[#allocation5 + $0x118] sm:$0xff]  ;;  %v366_v50 = vpack.c.bf16 %v72_v42, %v68_v41 }
  0x33   :  { %v83_v49 = vld [vmem:[#allocation5 + $0x138] sm:$0xff]  ;;  %v430_v51 = vpack.c.bf16 %v74_v45, %v70_v44  ;;  %v368_v52 = vpack.c.bf16 %v81_v47, %v77_v46  ;;  %v76_v53 = vld [vmem:[#allocation5 + $0x100] sm:$0xff]  ;;  %v78_v55 = vld [vmem:[#allocation5 + $0x110] sm:$0xff] }
  0x34   :  { %363 = vmatpush1.bf16.msra.mxu0 %v362_v34  ;;  %v80_v54 = vld [vmem:[#allocation5 + $0x120] sm:$0xff]  ;;  %v432_v56 = vpack.c.bf16 %v83_v49, %v79_v48  ;;  %v82_v57 = vld [vmem:[#allocation5 + $0x130] sm:$0xff]  ;;  %v85_v58 = vld [vmem:[#allocation5 + $0x148] sm:$0xff] }
  0x35   :  { %427 = vmatpush1.bf16.msra.mxu1 %v426_v38  ;;  %365 = vmatprep.subr.bf16.mxu0 %v364_v39  ;;  %v89_v59 = vld [vmem:[#allocation5 + $0x168] sm:$0xff]  ;;  %v87_v60 = vld [vmem:[#allocation5 + $0x158] sm:$0xff]  ;;  %v370_v62 = vpack.c.bf16 %v80_v54, %v76_v53  ;;  %v434_v63 = vpack.c.bf16 %v82_v57, %v78_v55  ;;  %v84_v1 = vld [vmem:[#allocation5 + $0x140] sm:$0xff] }
  0x36   :  { %429 = vmatprep.subr.bf16.mxu1 %v428_v43  ;;  %v91_v61 = vld [vmem:[#allocation5 + $0x178] sm:$0xff]  ;;  %v372_v0 = vpack.c.bf16 %v89_v59, %v85_v58  ;;  %v88_v2 = vld [vmem:[#allocation5 + $0x160] sm:$0xff]  ;;  %v86_v3 = vld [vmem:[#allocation5 + $0x150] sm:$0xff] }
  0x37   :  { %v436_v4 = vpack.c.bf16 %v91_v61, %v87_v60  ;;  %v90_v5 = vld [vmem:[#allocation5 + $0x170] sm:$0xff]  ;;  %v93_v6 = vld [vmem:[#allocation5 + $0x188] sm:$0xff]  ;;  %v95_v8 = vld [vmem:[#allocation5 + $0x198] sm:$0xff]  ;;  %v374_v10 = vpack.c.bf16 %v88_v2, %v84_v1 }
  0x38   :  { %367 = vmatpush1.bf16.msra.mxu0 %v366_v50  ;;  %v97_v7 = vld [vmem:[#allocation5 + $0x1a8] sm:$0xff]  ;;  %v99_v9 = vld [vmem:[#allocation5 + $0x1b8] sm:$0xff]  ;;  %v438_v11 = vpack.c.bf16 %v90_v5, %v86_v3  ;;  %v92_v13 = vld [vmem:[#allocation5 + $0x180] sm:$0xff] }
  0x39   :  { %431 = vmatpush1.bf16.msra.mxu1 %v430_v51  ;;  %369 = vmatprep.subr.bf16.mxu0 %v368_v52  ;;  %v376_v12 = vpack.c.bf16 %v97_v7, %v93_v6  ;;  %v96_v14 = vld [vmem:[#allocation5 + $0x1a0] sm:$0xff]  ;;  %v94_v15 = vld [vmem:[#allocation5 + $0x190] sm:$0xff]  ;;  %v440_v16 = vpack.c.bf16 %v99_v9, %v95_v8  ;;  %v101_v18 = vld [vmem:[#allocation5 + $0x1c8] sm:$0xff] }
  0x3a   :  { %433 = vmatprep.subr.bf16.mxu1 %v432_v56  ;;  %v98_v17 = vld [vmem:[#allocation5 + $0x1b0] sm:$0xff]  ;;  %v105_v19 = vld [vmem:[#allocation5 + $0x1e8] sm:$0xff]  ;;  %v103_v20 = vld [vmem:[#allocation5 + $0x1d8] sm:$0xff]  ;;  %v378_v22 = vpack.c.bf16 %v96_v14, %v92_v13 }
  0x3b   :  { %v107_v21 = vld [vmem:[#allocation5 + $0x1f8] sm:$0xff]  ;;  %v442_v23 = vpack.c.bf16 %v98_v17, %v94_v15  ;;  %v380_v24 = vpack.c.bf16 %v105_v19, %v101_v18  ;;  %v100_v25 = vld [vmem:[#allocation5 + $0x1c0] sm:$0xff]  ;;  %v102_v27 = vld [vmem:[#allocation5 + $0x1d0] sm:$0xff] }
  0x3c   :  { %371 = vmatpush1.bf16.msra.mxu0 %v370_v62  ;;  %v104_v26 = vld [vmem:[#allocation5 + $0x1e0] sm:$0xff]  ;;  %v444_v28 = vpack.c.bf16 %v107_v21, %v103_v20  ;;  %v106_v29 = vld [vmem:[#allocation5 + $0x1f0] sm:$0xff]  ;;  %v109_v30 = vld [vmem:[#allocation5 + $0x208] sm:$0xff] }
  0x3d   :  { %435 = vmatpush1.bf16.msra.mxu1 %v434_v63  ;;  %373 = vmatprep.subr.bf16.mxu0 %v372_v0  ;;  %v113_v31 = vld [vmem:[#allocation5 + $0x228] sm:$0xff]  ;;  %v111_v32 = vld [vmem:[#allocation5 + $0x218] sm:$0xff]  ;;  %v382_v34 = vpack.c.bf16 %v104_v26, %v100_v25  ;;  %v446_v35 = vpack.c.bf16 %v106_v29, %v102_v27  ;;  %v108_v37 = vld [vmem:[#allocation5 + $0x200] sm:$0xff] }
  0x3e   :  { %437 = vmatprep.subr.bf16.mxu1 %v436_v4  ;;  %v115_v33 = vld [vmem:[#allocation5 + $0x238] sm:$0xff]  ;;  %v384_v36 = vpack.c.bf16 %v113_v31, %v109_v30  ;;  %v112_v38 = vld [vmem:[#allocation5 + $0x220] sm:$0xff]  ;;  %v110_v39 = vld [vmem:[#allocation5 + $0x210] sm:$0xff] }
  0x3f   :  { %v448_v40 = vpack.c.bf16 %v115_v33, %v111_v32  ;;  %v114_v41 = vld [vmem:[#allocation5 + $0x230] sm:$0xff]  ;;  %v117_v42 = vld [vmem:[#allocation5 + $0x248] sm:$0xff]  ;;  %v119_v44 = vld [vmem:[#allocation5 + $0x258] sm:$0xff]  ;;  %v386_v46 = vpack.c.bf16 %v112_v38, %v108_v37 }
  0x40   :  { %375 = vmatpush1.bf16.msra.mxu0 %v374_v10  ;;  %v121_v43 = vld [vmem:[#allocation5 + $0x268] sm:$0xff]  ;;  %v123_v45 = vld [vmem:[#allocation5 + $0x278] sm:$0xff]  ;;  %v450_v47 = vpack.c.bf16 %v114_v41, %v110_v39  ;;  %v116_v49 = vld [vmem:[#allocation5 + $0x240] sm:$0xff] }
  0x41   :  { %439 = vmatpush1.bf16.msra.mxu1 %v438_v11  ;;  %377 = vmatprep.subr.bf16.mxu0 %v376_v12  ;;  %v388_v48 = vpack.c.bf16 %v121_v43, %v117_v42  ;;  %v120_v50 = vld [vmem:[#allocation5 + $0x260] sm:$0xff]  ;;  %v118_v51 = vld [vmem:[#allocation5 + $0x250] sm:$0xff]  ;;  %v452_v52 = vpack.c.bf16 %v123_v45, %v119_v44  ;;  %v125_v54 = vld [vmem:[#allocation5 + $0x288] sm:$0xff] }
  0x42   :  { %441 = vmatprep.subr.bf16.mxu1 %v440_v16  ;;  %v122_v53 = vld [vmem:[#allocation5 + $0x270] sm:$0xff]  ;;  %v129_v55 = vld [vmem:[#allocation5 + $0x2a8] sm:$0xff]  ;;  %v127_v56 = vld [vmem:[#allocation5 + $0x298] sm:$0xff]  ;;  %v390_v58 = vpack.c.bf16 %v120_v50, %v116_v49 }
  0x43   :  { %v131_v57 = vld [vmem:[#allocation5 + $0x2b8] sm:$0xff]  ;;  %v454_v59 = vpack.c.bf16 %v122_v53, %v118_v51  ;;  %v392_v60 = vpack.c.bf16 %v129_v55, %v125_v54  ;;  %v124_v61 = vld [vmem:[#allocation5 + $0x280] sm:$0xff]  ;;  %v126_v63 = vld [vmem:[#allocation5 + $0x290] sm:$0xff] }
  0x44   :  { %379 = vmatpush1.bf16.msra.mxu0 %v378_v22  ;;  %v128_v62 = vld [vmem:[#allocation5 + $0x2a0] sm:$0xff]  ;;  %v456_v0 = vpack.c.bf16 %v131_v57, %v127_v56  ;;  %v130_v1 = vld [vmem:[#allocation5 + $0x2b0] sm:$0xff]  ;;  %v133_v2 = vld [vmem:[#allocation5 + $0x2c8] sm:$0xff] }
  0x45   :  { %443 = vmatpush1.bf16.msra.mxu1 %v442_v23  ;;  %381 = vmatprep.subr.bf16.mxu0 %v380_v24  ;;  %v137_v3 = vld [vmem:[#allocation5 + $0x2e8] sm:$0xff]  ;;  %v135_v4 = vld [vmem:[#allocation5 + $0x2d8] sm:$0xff]  ;;  %v394_v6 = vpack.c.bf16 %v128_v62, %v124_v61  ;;  %v132_v7 = vld [vmem:[#allocation5 + $0x2c0] sm:$0xff]  ;;  %v458_v8 = vpack.c.bf16 %v130_v1, %v126_v63 }
  0x46   :  { %445 = vmatprep.subr.bf16.mxu1 %v444_v28  ;;  %v139_v5 = vld [vmem:[#allocation5 + $0x2f8] sm:$0xff]  ;;  %v396_v9 = vpack.c.bf16 %v137_v3, %v133_v2  ;;  %v136_v10 = vld [vmem:[#allocation5 + $0x2e0] sm:$0xff]  ;;  %v134_v11 = vld [vmem:[#allocation5 + $0x2d0] sm:$0xff] }
  0x47   :  { %v138_v12 = vld [vmem:[#allocation5 + $0x2f0] sm:$0xff]  ;;  %v460_v13 = vpack.c.bf16 %v139_v5, %v135_v4  ;;  %v141_v14 = vld [vmem:[#allocation5 + $0x308] sm:$0xff]  ;;  %v143_v17 = vld [vmem:[#allocation5 + $0x318] sm:$0xff]  ;;  %v398_v19 = vpack.c.bf16 %v136_v10, %v132_v7 }
  0x48   :  { %383 = vmatpush1.bf16.msra.mxu0 %v382_v34  ;;  %v145_v15 = vld [vmem:[#allocation5 + $0x328] sm:$0xff]  ;;  %v147_v18 = vld [vmem:[#allocation5 + $0x338] sm:$0xff]  ;;  %v462_v20 = vpack.c.bf16 %v138_v12, %v134_v11  ;;  %v140_v22 = vld [vmem:[#allocation5 + $0x300] sm:$0xff] }
  0x49   :  { %447 = vmatpush1.bf16.msra.mxu1 %v446_v35  ;;  %385 = vmatprep.subr.bf16.mxu0 %v384_v36  ;;  %v41_v16 = vld [vmem:[#allocation2 + $0x8] sm:$0xff]  ;;  %v400_v21 = vpack.c.bf16 %v145_v15, %v141_v14  ;;  %v144_v23 = vld [vmem:[#allocation5 + $0x320] sm:$0xff]  ;;  %v142_v24 = vld [vmem:[#allocation5 + $0x310] sm:$0xff]  ;;  %v464_v25 = vpack.c.bf16 %v147_v18, %v143_v17 }
  0x4a   :  { %449 = vmatprep.subr.bf16.mxu1 %v448_v40  ;;  %236 = vmatprep.mubr.f32.mxu0 %v41_v16  ;;  %v146_v26 = vld [vmem:[#allocation5 + $0x330] sm:$0xff]  ;;  %v149_v27 = vld [vmem:[#allocation5 + $0x348] sm:$0xff]  ;;  %v151_v29 = vld [vmem:[#allocation5 + $0x358] sm:$0xff]  ;;  %v402_v31 = vpack.c.bf16 %v144_v23, %v140_v22 }
  0x4b   :  { %313 = vmatprep.mubr.f32.mxu1 %v41_v16  ;;  %v153_v28 = vld [vmem:[#allocation5 + $0x368] sm:$0xff]  ;;  %v155_v30 = vld [vmem:[#allocation5 + $0x378] sm:$0xff]  ;;  %v466_v32 = vpack.c.bf16 %v146_v26, %v142_v24  ;;  %v148_v34 = vld [vmem:[#allocation5 + $0x340] sm:$0xff] }
  0x4c   :  { %387 = vmatpush1.bf16.msra.mxu0 %v386_v46  ;;  %v404_v33 = vpack.c.bf16 %v153_v28, %v149_v27  ;;  %v152_v35 = vld [vmem:[#allocation5 + $0x360] sm:$0xff]  ;;  %v150_v36 = vld [vmem:[#allocation5 + $0x350] sm:$0xff]  ;;  %v468_v37 = vpack.c.bf16 %v155_v30, %v151_v29  ;;  %v157_v39 = vld [vmem:[#allocation5 + $0x388] sm:$0xff] }
  0x4d   :  { %451 = vmatpush1.bf16.msra.mxu1 %v450_v47  ;;  %389 = vmatprep.subr.bf16.mxu0 %v388_v48  ;;  %v154_v38 = vld [vmem:[#allocation5 + $0x370] sm:$0xff]  ;;  %v161_v40 = vld [vmem:[#allocation5 + $0x3a8] sm:$0xff]  ;;  %v159_v41 = vld [vmem:[#allocation5 + $0x398] sm:$0xff]  ;;  %v406_v43 = vpack.c.bf16 %v152_v35, %v148_v34 }
  0x4e   :  { %453 = vmatprep.subr.bf16.mxu1 %v452_v52  ;;  %v163_v42 = vld [vmem:[#allocation5 + $0x3b8] sm:$0xff]  ;;  %v470_v44 = vpack.c.bf16 %v154_v38, %v150_v36  ;;  %v408_v45 = vpack.c.bf16 %v161_v40, %v157_v39  ;;  %v156_v46 = vld [vmem:[#allocation5 + $0x380] sm:$0xff]  ;;  %v158_v48 = vld [vmem:[#allocation5 + $0x390] sm:$0xff] }
  0x4f   :  { %v160_v47 = vld [vmem:[#allocation5 + $0x3a0] sm:$0xff]  ;;  %v472_v49 = vpack.c.bf16 %v163_v42, %v159_v41  ;;  %v162_v50 = vld [vmem:[#allocation5 + $0x3b0] sm:$0xff]  ;;  %v165_v51 = vld [vmem:[#allocation5 + $0x3c8] sm:$0xff] }
  0x50   :  { %391 = vmatpush1.bf16.msra.mxu0 %v390_v58  ;;  %v169_v52 = vld [vmem:[#allocation5 + $0x3e8] sm:$0xff]  ;;  %v167_v53 = vld [vmem:[#allocation5 + $0x3d8] sm:$0xff]  ;;  %v410_v55 = vpack.c.bf16 %v160_v47, %v156_v46  ;;  %v474_v56 = vpack.c.bf16 %v162_v50, %v158_v48  ;;  %v164_v58 = vld [vmem:[#allocation5 + $0x3c0] sm:$0xff] }
  0x51   :  { %455 = vmatpush1.bf16.msra.mxu1 %v454_v59  ;;  %393 = vmatprep.subr.bf16.mxu0 %v392_v60  ;;  %v171_v54 = vld [vmem:[#allocation5 + $0x3f8] sm:$0xff]  ;;  %v412_v57 = vpack.c.bf16 %v169_v52, %v165_v51  ;;  %v168_v59 = vld [vmem:[#allocation5 + $0x3e0] sm:$0xff]  ;;  %v166_v61 = vld [vmem:[#allocation5 + $0x3d0] sm:$0xff] }
  0x52   :  { %457 = vmatprep.subr.bf16.mxu1 %v456_v0  ;;  %v476_v60 = vpack.c.bf16 %v171_v54, %v167_v53  ;;  %v170_v62 = vld [vmem:[#allocation5 + $0x3f0] sm:$0xff]  ;;  %v414_v63 = vpack.c.bf16 %v168_v59, %v164_v58  ;;  %v40_v1 = vld [vmem:[#allocation2] sm:$0xff]  ;;  %v43_v2 = vld [vmem:[#allocation2 + $0x18] sm:$0xff] }
  0x53   :  { %v478_v0 = vpack.c.bf16 %v170_v62, %v166_v61  ;;  %v42_v3 = vld [vmem:[#allocation2 + $0x10] sm:$0xff] }
  0x54   :  { %395 = vmatpush1.bf16.msra.mxu0 %v394_v6 }
  0x55   :  { %459 = vmatpush1.bf16.msra.mxu1 %v458_v8  ;;  %397 = vmatprep.subr.bf16.mxu0 %v396_v9 }
  0x56   :  { %461 = vmatprep.subr.bf16.mxu1 %v460_v13 }
  0x58   :  { %399 = vmatpush1.bf16.msra.mxu0 %v398_v19 }
  0x59   :  { %463 = vmatpush1.bf16.msra.mxu1 %v462_v20  ;;  %401 = vmatprep.subr.bf16.mxu0 %v400_v21 }
  0x5a   :  { %465 = vmatprep.subr.bf16.mxu1 %v464_v25 }
  0x5c   :  { %403 = vmatpush1.bf16.msra.mxu0 %v402_v31 }
  0x5d   :  { %467 = vmatpush1.bf16.msra.mxu1 %v466_v32  ;;  %405 = vmatprep.subr.bf16.mxu0 %v404_v33 }
  0x5e   :  { %469 = vmatprep.subr.bf16.mxu1 %v468_v37 }
  0x60   :  { %407 = vmatpush1.bf16.msra.mxu0 %v406_v43 }
  0x61   :  { %471 = vmatpush1.bf16.msra.mxu1 %v470_v44  ;;  %409 = vmatprep.subr.bf16.mxu0 %v408_v45 }
  0x62   :  { %473 = vmatprep.subr.bf16.mxu1 %v472_v49 }
  0x64   :  { %411 = vmatpush1.bf16.msra.mxu0 %v410_v55 }
  0x65   :  { %475 = vmatpush1.bf16.msra.mxu1 %v474_v56  ;;  %413 = vmatprep.subr.bf16.mxu0 %v412_v57 }
  0x66   :  { %477 = vmatprep.subr.bf16.mxu1 %v476_v60 }
  0x68   :  { %415 = vmatpush1.bf16.msra.mxu0 %v414_v63 }
  0x69   :  { %479 = vmatpush1.bf16.msra.mxu1 %v478_v0 }
  0x6b   :  { %237 = vmatmul.mubr.f32.vlgmr.msra.gmra.mrb[0].mxu0 %v40_v1 }
  0x6c   :  { %314 = vmatmul.mubr.f32.vlgmr.msra.gmra.mrb[0].mxu1 %v40_v1  ;;  %242 = vmatprep.mubr.f32.mxu0 %v43_v2 }
  0x6d   :  { %319 = vmatprep.mubr.f32.mxu1 %v43_v2 }
  0x6f   :  { %243 = vmatmul.mubr.f32.gmra.mrb[2].mxu0 %v42_v3 }
  0x70   :  { %320 = vmatmul.mubr.f32.gmra.mrb[2].mxu1 %v42_v3 }
 0x13e   :  { %v238_v4 = vpop.f32.mrb[0].mxu0 }
 0x13f   :  { %326 = vst [vmem:[#allocation7] sm:$0xff] %v238_v4  ;;  %v315_v5 = vpop.f32.mrb[0].mxu1  ;;  %v240_v6 = vpop.f32.mrb[1].mxu0 }
 0x140   :  { %328 = vst [vmem:[#allocation7 + $0x10] sm:$0xff] %v315_v5  ;;  %327 = vst [vmem:[#allocation7 + $0x8] sm:$0xff] %v240_v6  ;;  %v317_v7 = vpop.f32.mrb[1].mxu1 }
 0x141   :  { %329 = vst [vmem:[#allocation7 + $0x18] sm:$0xff] %v317_v7 }
 0x142   :  { %v244_v8 = vpop.f32.mrb[2].mxu0 }
 0x143   :  { %330 = vst [vmem:[#allocation7 + $0x20] sm:$0xff] %v244_v8  ;;  %v321_v9 = vpop.f32.mrb[2].mxu1  ;;  %v246_v10 = vpop.f32.mrb[3].mxu0 }
 0x144   :  { %332 = vst [vmem:[#allocation7 + $0x30] sm:$0xff] %v321_v9  ;;  %331 = vst [vmem:[#allocation7 + $0x28] sm:$0xff] %v246_v10  ;;  %v323_v11 = vpop.f32.mrb[3].mxu1 }
 0x145   :  { %333 = vst [vmem:[#allocation7 + $0x38] sm:$0xff] %v323_v11 }
 0x146   :  { %542 = shalt.err (!%p539_p6)
}
 0x147   :  { %s543_s12 = scalar_lea.hbm %s625_s2, 1024 }
 0x148   :  { %p544_p7 = scmp.ne.s32.totalorder %s625_s2, %s543_s12  ;;  %p547_p8 = scmp.lt.u32.totalorder %s543_s12, %s625_s2 }
 0x14a   :  { %p549_p9 = pnand %p547_p8, %p544_p7 }
 0x14c   :  { %552 = shalt.err (!%p549_p9)
}
 0x14d   :  { %345 = dma.vmem_to_hbm [thread:$0]  %s340_s8, 1024, %s625_s2, [#allocation4], %s563_s0, %s563_s0, %s564_s5  }
 0x14e   :  { %557 = dma.done.wait [#allocation4], 1024  }
 0x14f   :  { %558 = vsyncadd [#allocation4], 4294966272 }
 0x150   :  { %349 = vsyncpa [#allocation3], 1 }
 0x151   :  { %350 = vsyncpa [#allocation6], 1 }
 0x152   :  { %351 = vsyncpa [#allocation4], 1 }

</bundles_post_ra>
